<compile_context>
chip_gen: v6e
topology: v6e:2x2x1
jax: 0.10.0
libtpu: 0.0.40
codegen_flags: <defaults>
</compile_context>

<pallas_src>
import functools

import jax
import jax.numpy as jnp
import numpy as np
from jax.experimental import pallas as pl
from jax.experimental.pallas import tpu as pltpu

LEAKY_SLOPE = 0.01   # nn.LeakyReLU default negative_slope
BN_EPS = 1e-5        # nn.BatchNorm1d default eps


def _round_up(n, m):
    return ((n + m - 1) // m) * m


def _dnn_stream_kernel(x_ref, w_ref, b_ref, o_ref, act_ref, *, num_layers):
    """One (batch_tile, layer) grid step.

    x_ref   : (BM, PAD)      padded input activations (f32)
    w_ref   : (1, PAD, PAD)  current layer's BN-folded weight (bf16)
    b_ref   : (1, 1, PAD)    current layer's BN-folded bias (f32)
    o_ref   : (BM, PAD)      padded output tile
    act_ref : (BM, PAD)      f32 activation carry (VMEM scratch)
    """
    l = pl.program_id(1)

    @pl.when(l == 0)
    def _init():
        act_ref[...] = x_ref[...].astype(jnp.float32)

    x_bf = act_ref[...].astype(jnp.bfloat16)
    y = jnp.dot(x_bf, w_ref[0], preferred_element_type=jnp.float32)
    y = y + b_ref[0]

    @pl.when(l < num_layers - 1)           # hidden layers: LeakyReLU, carry on
    def _hidden():
        act_ref[...] = jnp.maximum(y, LEAKY_SLOPE * y)

    @pl.when(l == num_layers - 1)          # output layer: no activation
    def _final():
        o_ref[...] = y.astype(o_ref.dtype)


@functools.partial(jax.jit, static_argnames=("output_dim",))
def dnn_forward(x, w_stack, b_stack, output_dim):
    """Fused forward: pad -> streamed pallas_call over (batch_tiles, L) -> slice."""
    B, Din = x.shape
    L, PAD, _ = w_stack.shape

    # Batch tiling: up to 256 rows (MXU height on v6e/v7x), >=8 sublanes.
    BM = 256 if B >= 256 else _round_up(max(B, 8), 8)
    B_pad = _round_up(max(B, BM), BM)
    n_m = B_pad // BM

    x_pad = jnp.zeros((B_pad, PAD), x.dtype).at[:B, :Din].set(x)

    # VMEM budget: double-buffered weight/bias/x/out tiles + activation scratch,
    # 2x headroom, floor 8 MiB, cap at 64 MiB (v7x physical VMEM per TC).
    w_tile_b = PAD * PAD * 2            # bf16
    b_tile_b = PAD * 4
    act_tile_b = BM * PAD * 4
    per_step = 2 * (w_tile_b + b_tile_b + 2 * act_tile_b) + act_tile_b
    vmem_limit = int(min(max(2 * per_step, 8 * 1024 * 1024), 64 * 1024 * 1024))

    out_pad = pl.pallas_call(
        functools.partial(_dnn_stream_kernel, num_layers=L),
        out_shape=jax.ShapeDtypeStruct((B_pad, PAD), x.dtype),
        grid_spec=pltpu.PrefetchScalarGridSpec(
            num_scalar_prefetch=0,
            grid=(n_m, L),
            in_specs=[
                pl.BlockSpec((BM, PAD), lambda m, l: (m, 0)),
                pl.BlockSpec((1, PAD, PAD), lambda m, l: (l, 0, 0)),
                pl.BlockSpec((1, 1, PAD), lambda m, l: (l, 0, 0)),
            ],
            out_specs=pl.BlockSpec((BM, PAD), lambda m, l: (m, 0)),
            scratch_shapes=[pltpu.VMEM((BM, PAD), jnp.float32)],
        ),
        compiler_params=pltpu.CompilerParams(
            dimension_semantics=("parallel", "arbitrary"),
            vmem_limit_bytes=vmem_limit),
        cost_estimate=pl.CostEstimate(
            flops=2 * B_pad * PAD * PAD * L,
            bytes_accessed=(L * PAD * PAD * 2 + L * PAD * 4
                            + 2 * B_pad * PAD * 4),
            transcendentals=0),
    )(x_pad, w_stack, b_stack)

    return out_pad[:B, :output_dim]


def fold_and_pad_params(params, pad_dim):
    """One-time: fold eval-mode BN into Linear, pad, cast weights to bf16, stack."""
    ws, bs = [], []
    for p in params:
        scale = p["gamma"] * jax.lax.rsqrt(p["run_var"] + BN_EPS)
        shift = p["beta"] - p["run_mean"] * scale
        w_t = p["w"].T                                  # (Din, Dout)
        w_f = scale[:, None] * w_t                      # fold BN scale
        b_f = shift @ w_t + p["b"]                      # fold BN shift
        din, dout = w_f.shape
        w_pad = jnp.zeros((pad_dim, pad_dim), jnp.float32).at[:din, :dout].set(w_f)
        b_pad = jnp.zeros((1, pad_dim), jnp.float32).at[0, :dout].set(b_f)
        ws.append(w_pad.astype(jnp.bfloat16))           # bf16 weights (MXU-native)
        bs.append(b_pad)                                 # f32 bias (negligible bytes)
    return jnp.stack(ws), jnp.stack(bs)


def init_dnn_params(key, input_dim, emb_dim, num_layer, output_dim):
    """Deterministic synthetic params matching the PyTorch module layout."""
    dims = [(input_dim, emb_dim)]
    dims += [(emb_dim, emb_dim) for _ in range(num_layer - 1)]
    dims += [(emb_dim, output_dim)]

    params = []
    for (din, dout) in dims:
        key, k_g, k_b, k_m, k_v, k_w, k_bi = jax.random.split(key, 7)
        gamma = 1.0 + 0.1 * jax.random.normal(k_g, (din,), jnp.float32)
        beta = 0.1 * jax.random.normal(k_b, (din,), jnp.float32)
        run_mean = 0.1 * jax.random.normal(k_m, (din,), jnp.float32)
        run_var = jnp.abs(1.0 + 0.1 * jax.random.normal(k_v, (din,), jnp.float32))
        bound = 1.0 / float(np.sqrt(din))
        w = jax.random.uniform(k_w, (dout, din), jnp.float32, -bound, bound)
        bias = jax.random.uniform(k_bi, (dout,), jnp.float32, -bound, bound)
        params.append(dict(gamma=gamma, beta=beta, run_mean=run_mean,
                           run_var=run_var, w=w, b=bias))
    return params


def dnn_reference(params, x):
    """Plain-JAX eval-mode reference (unfolded, full f32) for correctness check."""
    n = len(params)
    for i, p in enumerate(params):
        scale = p["gamma"] / jnp.sqrt(p["run_var"] + BN_EPS)
        shift = p["beta"] - p["run_mean"] * scale
        y = (x * scale + shift) @ p["w"].T + p["b"]
        if i < n - 1:
            y = jnp.where(y >= 0, y, LEAKY_SLOPE * y)
        x = y
    return x


if __name__ == "__main__":
    input_dim, emb_dim, num_layer, output_dim = 16, 32, 3, 4
    batch = 8

    key = jax.random.PRNGKey(0)
    key, k_x, k_p = jax.random.split(key, 3)
    x = jax.random.normal(k_x, (batch, input_dim), jnp.float32)
    params = init_dnn_params(k_p, input_dim, emb_dim, num_layer, output_dim)

    pad_dim = _round_up(max(input_dim, emb_dim, output_dim), 128)
    w_stack, b_stack = fold_and_pad_params(params, pad_dim)

    out = dnn_forward(x, w_stack, b_stack, output_dim)
    jax.block_until_ready(out)
    assert out.shape == (batch, output_dim)

    # bf16 weights => loosened tolerance vs. the full-f32 reference.
    ref = dnn_reference(params, x)
    np.testing.assert_allclose(np.asarray(out), np.asarray(ref),
                               rtol=5e-2, atol=5e-2)
    print("KERNEL_OK")
</pallas_src>

<mosaic_0001>
module attributes {stable_mosaic.version = 11 : i64} {
  func.func @_dnn_stream_kernel(%arg0: i32, %arg1: i32, %arg2: memref<8x128xf32, #tpu.memory_space<vmem>>, %arg3: memref<1x128x128xbf16, #tpu.memory_space<vmem>>, %arg4: memref<1x1x128xf32, #tpu.memory_space<vmem>>, %arg5: memref<8x128xf32, #tpu.memory_space<vmem>>, %arg6: memref<8x128xf32, #tpu.memory_space<vmem>>) attributes {dimension_semantics = [#tpu.dimension_semantics<parallel>, #tpu.dimension_semantics<arbitrary>], iteration_bounds = array<i64: 1, 4>, scalar_prefetch = 0 : i64, scratch_operands = 1 : i64, tpu.core_type = #tpu.core_type<tc>, window_params = [{transform_indices = @transform_0, window_bounds = array<i64: 8, 128>}, {transform_indices = @transform_1, window_bounds = array<i64: 1, 128, 128>}, {transform_indices = @transform_2, window_bounds = array<i64: 1, 1, 128>}, {transform_indices = @transform_3, window_bounds = array<i64: 8, 128>}]} {
    %c0_i32 = arith.constant 0 : i32
    %0 = arith.cmpi eq, %arg1, %c0_i32 : i32
    %1 = arith.extui %0 : i1 to i32
    %c0_i32_0 = arith.constant 0 : i32
    %2 = arith.cmpi ne, %1, %c0_i32_0 : i32
    scf.if %2 {
      %c0_11 = arith.constant 0 : index
      %c0_12 = arith.constant 0 : index
      %18 = vector.load %arg2[%c0_11, %c0_12] : memref<8x128xf32, #tpu.memory_space<vmem>>, vector<8x128xf32>
      %c0_13 = arith.constant 0 : index
      %c0_14 = arith.constant 0 : index
      %19 = vector.load %arg6[%c0_13, %c0_14] : memref<8x128xf32, #tpu.memory_space<vmem>>, vector<8x128xf32>
      tpu.vector_store %arg6[%c0_13, %c0_14], %18 {strides = array<i32>} : memref<8x128xf32, #tpu.memory_space<vmem>>, vector<8x128xf32>,
    } else {
    }
    %c0 = arith.constant 0 : index
    %c0_1 = arith.constant 0 : index
    %3 = vector.load %arg6[%c0, %c0_1] : memref<8x128xf32, #tpu.memory_space<vmem>>, vector<8x128xf32>
    %4 = arith.truncf %3 : vector<8x128xf32> to vector<8x128xbf16>
    %c0_2 = arith.constant 0 : index
    %c0_3 = arith.constant 0 : index
    %c0_4 = arith.constant 0 : index
    %5 = vector.load %arg3[%c0_2, %c0_3, %c0_4] : memref<1x128x128xbf16, #tpu.memory_space<vmem>>, vector<1x128x128xbf16>
    %6 = vector.shape_cast %5 : vector<1x128x128xbf16> to vector<128x128xbf16>
    %cst = arith.constant dense<0.000000e+00> : vector<8x128xf32>
    %7 = tpu.matmul %4, %6, %cst {dimension_numbers = #tpu.dot_dimension_numbers<[1], [0], [0], [1], [0, 0, 1, 1], [], []>} : vector<8x128xbf16>, vector<128x128xbf16>, vector<8x128xf32> -> vector<8x128xf32>
    %c0_5 = arith.constant 0 : index
    %c0_6 = arith.constant 0 : index
    %c0_7 = arith.constant 0 : index
    %8 = vector.load %arg4[%c0_5, %c0_6, %c0_7] : memref<1x1x128xf32, #tpu.memory_space<vmem>>, vector<1x1x128xf32>
    %9 = vector.shape_cast %8 : vector<1x1x128xf32> to vector<1x128xf32>
    %10 = vector.broadcast %9 : vector<1x128xf32> to vector<8x128xf32>
    %11 = arith.addf %7, %10 : vector<8x128xf32>
    %c3_i32 = arith.constant 3 : i32
    %12 = arith.cmpi slt, %arg1, %c3_i32 : i32
    %13 = arith.extui %12 : i1 to i32
    %c0_i32_8 = arith.constant 0 : i32
    %14 = arith.cmpi ne, %13, %c0_i32_8 : i32
    scf.if %14 {
      %cst_11 = arith.constant 0.00999999977 : f32
      %18 = vector.broadcast %cst_11 : f32 to vector<8x128xf32>
      %19 = arith.mulf %18, %11 : vector<8x128xf32>
      %20 = arith.maximumf %11, %19 : vector<8x128xf32>
      %c0_12 = arith.constant 0 : index
      %c0_13 = arith.constant 0 : index
      %21 = vector.load %arg6[%c0_12, %c0_13] : memref<8x128xf32, #tpu.memory_space<vmem>>, vector<8x128xf32>
      tpu.vector_store %arg6[%c0_12, %c0_13], %20 {strides = array<i32>} : memref<8x128xf32, #tpu.memory_space<vmem>>, vector<8x128xf32>,
    } else {
    }
    %c3_i32_9 = arith.constant 3 : i32
    %15 = arith.cmpi eq, %arg1, %c3_i32_9 : i32
    %16 = arith.extui %15 : i1 to i32
    %c0_i32_10 = arith.constant 0 : i32
    %17 = arith.cmpi ne, %16, %c0_i32_10 : i32
    scf.if %17 {
      %c0_11 = arith.constant 0 : index
      %c0_12 = arith.constant 0 : index
      %18 = vector.load %arg5[%c0_11, %c0_12] : memref<8x128xf32, #tpu.memory_space<vmem>>, vector<8x128xf32>
      tpu.vector_store %arg5[%c0_11, %c0_12], %11 {strides = array<i32>} : memref<8x128xf32, #tpu.memory_space<vmem>>, vector<8x128xf32>,
    } else {
    }
    return
  }
  func.func @transform_0(%arg0: i32, %arg1: i32) -> (i32, i32) {
    %c0_i32 = arith.constant 0 : i32
    %c0_i32_0 = arith.constant 0 : i32
    return %arg0, %c0_i32 : i32, i32
  }
  func.func @transform_1(%arg0: i32, %arg1: i32) -> (i32, i32, i32) {
    %c0_i32 = arith.constant 0 : i32
    %c0_i32_0 = arith.constant 0 : i32
    %c0_i32_1 = arith.constant 0 : i32
    return %arg1, %c0_i32, %c0_i32_0 : i32, i32, i32
  }
  func.func @transform_2(%arg0: i32, %arg1: i32) -> (i32, i32, i32) {
    %c0_i32 = arith.constant 0 : i32
    %c0_i32_0 = arith.constant 0 : i32
    %c0_i32_1 = arith.constant 0 : i32
    return %arg1, %c0_i32, %c0_i32_0 : i32, i32, i32
  }
  func.func @transform_3(%arg0: i32, %arg1: i32) -> (i32, i32) {
    %c0_i32 = arith.constant 0 : i32
    %c0_i32_0 = arith.constant 0 : i32
    return %arg0, %c0_i32 : i32, i32
  }
}

</mosaic_0001>

<bundles_post_ra>
// kernel: dnn_forward.1
= control target key start
LH: loop header
LB: loop body
LE: loop exit
PB: predicated region body
PF: predicated region fallthrough
CT: control target
= control target key end

     0   :  { %8 = vsyncpa [#allocation4], 0  ;;  %s807_s0 = inlined_call_operand.vmem [shape: f32[8,128], index: 0, kind: input, shape index: {}]   ;;  %s808_s1 = inlined_call_operand.hbm [shape: bf16[4,128,128], index: 1, kind: input, shape index: {}]   ;;  %s809_s2 = inlined_call_operand.vmem [shape: f32[4,1,128], index: 2, kind: input, shape index: {}]   ;;  %s810_s3 = inlined_call_operand.vmem [shape: f32[8,128], index: 3, kind: output, shape index: {}]  }
   0x1   :  { %10 = vsyncpa [#allocation4 + $0x1], 0  ;;  %s684_s12 = smov 0   ;;  %s686_s13 = smov 0  }
   0x2   :  { %s688_s14 = smov 0   ;;  %s690_s15 = smov 0  }
   0x3   :  { %s692_s16 = smov 0   ;;  %s694_s17 = smov 0  }
   0x4 LB: > { %s458_s18 = sadd.s32 4294967295, %s657_s17   ;;  %s25_s19 = sadd.s32 1, %s653_s16  ;;  %s657_s17 = sphi %s694_s17, %s16_s17   ;;  %s653_s16 = sphi %s692_s16, %s818_s16   ;;  %s649_s15 = sphi %s690_s15, %s817_s15   ;;  %s645_s14 = sphi %s688_s14, %s816_s14   ;;  %s641_s13 = sphi %s686_s13, %s815_s13   ;;  %s637_s12 = sphi %s684_s12, %s814_s12  }
   0x5   : > { %p26_p0 = scmp.ge.s32.totalorder %s25_s19, 4  ;;  %s61_s20 = sadd.s32 1, %s645_s14 }
   0x6   : > { %p68_p1 = scmp.ne.s32.totalorder %s645_s14, %s641_s13  ;;  %p69_p2 = scmp.eq.s32.totalorder %s657_s17, 0 }
   0x7   : > { %s820_s19 = smov (%p26_p0, %s25_s19), 0  ;;  %p74_p4 = scmp.ne.s32.totalorder %s641_s13, %s637_s12 }
   0x8   : > { %p720_p3 = por %p69_p2, %p68_p1  ;;  %s58_s22 = ssub.s32 %s653_s16, %s820_s19 }
   0x9   : > { %p75_p5 = scmp.eq.s32.totalorder %s458_s18, 0  ;;  %p59_p6 = scmp.eq.s32.totalorder %s58_s22, 0 }
   0xa   : > { %p518_p8 = scmp.lt.s32.totalorder %s657_s17, 4  ;;  %s157_s25 = sand.u32 1, %s645_s14  }
   0xb   : > { %p727_p7 = por %p75_p5, %p74_p4  ;;  %s482_s26 = sshll.u32 %s653_s16, 10 }
   0xc   : > { %s733_s24 = scalar_select %p59_p6, %s645_s14, %s61_s20  }
   0xd   : > { %s462_s27 = sshll.u32 %s157_s25, 6  ;;  %s167_s30 = scalar_lea.hbm %s808_s1, %s482_s26 }
   0xe   : > { %s161_s4 = scalar_lea.vmem [#allocation3], %s462_s27  ;;  %p742_p9 = pnand %p518_p8, %p720_p3 }
   0xf   : > { %s168_s5 = sshll.u32 %s161_s4, 4  ;;  %s158_s7 = scalar_lea.sflag [#allocation4], %s157_s25  ;;  %s169_s5 = int_to_ptr.vmem [resolvable:$true] %s168_s5 }
  0x10   : > { %p581_p10 = pneg %p742_p9  ;;  %s592_s8 = scalar_lea.vmem %s169_s5, 1024 }
  0x11   : > { %p593_p11 = scmp.ne.s32.totalorder %s169_s5, %s592_s8  ;;  %s659_s9 = smov [#allocation3]  }
  0x12   : > { %s597_s10 = sshll.u32 %s659_s9, 4  ;;  %s598_s10 = int_to_ptr.vmem [resolvable:$false] %s597_s10 }
  0x13   : > { %p595_p12 = pnand %p593_p11, %p581_p10  ;;  %s599_s11 = scalar_lea.vmem %s598_s10, 2048 }
  0x14   : > { %p600_p0 = scmp.lt.s32.totalorder %s169_s5, %s598_s10  ;;  %p601_p1 = scmp.lt.s32.totalorder %s599_s11, %s592_s8 }
  0x15   : > { %p596_p13 = pneg %p595_p12 }
  0x16   : > { %p602_p2 = por %p601_p1, %p600_p0 }
  0x18   : > { %p603_p3 = pnand %p602_p2, %p596_p13 }
  0x1a   : > { %606 = shalt.err (!%p603_p3)
}
  0x1b   : > { %s660_s12 = smov 64   ;;  %s661_s18 = smov 4  }
  0x1c   : > { %517 = dma.hbm_to_vmem [thread:$0]  (!%p742_p9), %s167_s30, 1024, %s169_s5, %s158_s7, %s660_s12, %s660_s12, %s661_s18  }
  0x1d   : > { %p465_p4 = scmp.ge.s32.totalorder %s657_s17, 1  ;;  %p182_p5 = scmp.lt.s32.totalorder %s657_s17, 5 }
  0x1f   : > { %p183_p6 = pnand %p465_p4, %p182_p5 }
  0x20   : > { %s188_s20 = sand.u32 (!%p183_p6), 1, %s641_s13  }
  0x21   : > { %186 = sbr.rel (%p183_p6) target bundleno = 294 (0x126), region = 32  ;;  %s466_s21 = sshll.u32 (!%p183_p6), %s188_s20, 6 }
  0x22   : > { %s189_s22 = scalar_lea.sflag (!%p183_p6), [#allocation4], %s188_s20  ;;  %s753_s25 = scalar_lea.vmem (!%p183_p6), [#allocation3], %s466_s21 }
  0x26   : > { %632 = dma.done.wait (%p727_p7), %s189_s22, 1024  }
  0x27   : > { %634 = vsyncadd (%p727_p7), %s189_s22, 4294966272  ;;  %p225_p8 = scmp.lt.s32.totalorder %s649_s15, 3  ;;  %p467_p9 = scmp.ne.s32.totalorder %s649_s15, 0 }
  0x29   : > { %s761_s26 = scalar_select %p225_p8, %s649_s15, 3 }
  0x2a   : > { %236 = sbr.rel (%p467_p9) target bundleno = 49 (0x31), region = 40 }
  0x2b   : > { %s227_s29 = scalar_lea.vmem %s809_s2, %s761_s26 }
  0x2f   : > { %v237_v0 = vld [vmem:[%s807_s0] sm:$0xff] }
  0x30   : > { %238 = vst [vmem:[#allocation2] sm:$0xff] %v237_v0 }
  0x31 PF: > { %v571_v1 = vld [vmem:[%s753_s25 + $0x38] sm:$0xff]   ;;  %v662_v2 = vmov 0.0   ;;  %v572_v3 = vld [vmem:[%s753_s25 + $0x30] sm:$0xff]   ;;  %vm663_vm0 = vmmov 0   ;;  %v573_v4 = vld [vmem:[%s753_s25 + $0x28] sm:$0xff]   ;;  %p477_p7 = scmp.ge.s32.totalorder %s649_s15, 3 }
  0x32   : > { %492 = vmatprep.subr.bf16.mxu0 %v662_v2  ;;  %508 = vmatprep.mubr.msk.bf16.mxu0 %vm663_vm0, %v662_v2  ;;  %v574_v5 = vld [vmem:[%s753_s25 + $0x20] sm:$0xff]   ;;  %v575_v6 = vld [vmem:[%s753_s25 + $0x18] sm:$0xff]   ;;  %v576_v7 = vld [vmem:[%s753_s25 + $0x10] sm:$0xff]  }
  0x33   : > { %493 = vmatpush3.bf16.msra.mxu0 %v571_v1  ;;  %v577_v8 = vld [vmem:[%s753_s25 + $0x8] sm:$0xff]   ;;  %v578_v9 = vld [vmem:[%s753_s25] sm:$0xff]   ;;  %v468_v12 = vld [vmem:[%s227_s29] ss:$0 sm:$0xff] }
  0x34   : > { %494 = vmatprep.subr.bf16.mxu0 %v662_v2 }
  0x37   : > { %495 = vmatpush3.bf16.msra.mxu0 %v572_v3  ;;  %v239_v10 = vld [vmem:[#allocation2] sm:$0xff] }
  0x38   : > { %496 = vmatprep.subr.bf16.mxu0 %v662_v2  ;;  %v240_v11 = vpack.c.bf16 %v239_v10, %v239_v10 }
  0x3b   : > { %497 = vmatpush3.bf16.msra.mxu0 %v573_v4 }
  0x3c   : > { %498 = vmatprep.subr.bf16.mxu0 %v662_v2 }
  0x3f   : > { %499 = vmatpush3.bf16.msra.mxu0 %v574_v5 }
  0x40   : > { %500 = vmatprep.subr.bf16.mxu0 %v662_v2 }
  0x43   : > { %501 = vmatpush3.bf16.msra.mxu0 %v575_v6 }
  0x44   : > { %502 = vmatprep.subr.bf16.mxu0 %v662_v2 }
  0x47   : > { %503 = vmatpush3.bf16.msra.mxu0 %v576_v7 }
  0x48   : > { %504 = vmatprep.subr.bf16.mxu0 %v662_v2 }
  0x4b   : > { %505 = vmatpush3.bf16.msra.mxu0 %v577_v8 }
  0x4c   : > { %506 = vmatprep.subr.bf16.mxu0 %v662_v2 }
  0x4f   : > { %507 = vmatpush3.bf16.msra.mxu0 %v578_v9 }
  0x52   : > { %509 = vmatmul.mubr.bf16.vlgmr.msra.gmra.mxu0 %v240_v11 }
 0x112   : > { %v346_v13 = vpop.f32.mrf.mxu0 }
 0x113   : > { %v347_v14 = vadd.f32 %v468_v12, %v346_v13 }
 0x114   : > { %v510_v15 = vpop.f32.mrf.mxu0  ;;  %355 = sbr.rel (%p477_p7) target bundleno = 286 (0x11e), region = 44 }
 0x116   : > { %v349_v16 = vpop.f32.mrf.mxu0 }
 0x118   : > { %v511_v17 = vpop.f32.mrf.mxu0 }
 0x119   : > { %v356_v18 = vmul.f32 0.01, %v347_v14 }
 0x11b   : > { %v357_v19 = vmax.f32 %v347_v14, %v356_v18 }
 0x11d   : > { %358 = vst [vmem:[#allocation2] sm:$0xff] %v357_v19 }
 0x11e PF: > { %p478_p10 = scmp.ne.s32.totalorder %s649_s15, 3 }
 0x120   : > { %362 = sbr.rel (%p478_p10) target bundleno = 294 (0x126), region = 48 }
 0x125   : > { %363 = vst [vmem:[%s810_s3] sm:$0xff] %v347_v14 }
 0x126 PF: > { %s16_s17 = sadd.s32 1, %s657_s17   ;;  %s814_s12 = smov %s641_s13 }
 0x127   : > { %p13_p11 = scmp.ge.s32.totalorder %s16_s17, 6   ;;  %s815_s13 = smov %s645_s14 }
 0x128   : > { %s816_s14 = smov %s733_s24  ;;  %s817_s15 = smov %s653_s16 }
 0x129   : > { %s818_s16 = smov %s820_s19  ;;  %15 = sbr.rel (!%p13_p11) target bundleno = 4 (0x4), region = 90 }
 0x12e   :  { %383 = vsyncpa [#allocation4], 1 }
 0x12f   :  { %385 = vsyncpa [#allocation4 + $0x1], 1 }

</bundles_post_ra>
